<compile_context>
chip_gen: v7x
topology: tpu7x:2x2x1
jax: 0.10.0
libtpu: 0.0.40
codegen_flags: <defaults>
</compile_context>

<pallas_src>
import functools

import numpy as np
import jax
import jax.numpy as jnp
from jax.experimental import pallas as pl
from jax.experimental.pallas import tpu as pltpu


def _attention_block_kernel(x_ref, tapw_ref, slab_ref, o_ref, *, NC, H, W, shifts):
  """Fused AttentionBlock forward on one batch-packed (NC, H*W) slab.

  x_ref    : (NC, HW)      input, rows = n*C + c (batch packed on sublanes)
  tapw_ref : (9, NC, HW)   per-tap boundary-mask * depthwise-weight (pre-fused)
  slab_ref : (NC, 3*S+3)   packed constants: [c1 shift-cols | pw shift-cols |
                            att shift-cols | b_x | b_g | ab] (S = len(shifts))
  o_ref    : (NC, HW)      output
  """
  HW = H * W
  x = x_ref[...]                                     # (NC, HW) dense slab
  n_s = len(shifts)

  def col(j):                                        # (NC, 1) weight column
    return slab_ref[:, j:j + 1]                      # lane-broadcasts for free

  def channel_mix(v, base):
    # Block-diagonal (per-image) 1x1 conv: out[p,:] = sum_q Wbig[p,q] * v[q,:],
    # written as a sum over static sublane rotations. Weights live in (NC,1)
    # columns (cheap lane broadcast); data movement is a few static sublane
    # rolls on the XLU. No sublane broadcasts of activation rows, no zero init.
    out = col(base) * v                              # shifts[0] == 0 -> no roll
    for j in range(1, n_s):
      d = shifts[j]
      out = out + col(base + j) * pltpu.roll(v, shift=(NC - d) % NC, axis=0)
    return out

  # ---- x-branch: conv1x1 (bn2 scale folded in) + bias + ReLU -----------------
  xo = jnp.maximum(channel_mix(x, 0) + col(3 * n_s), 0.0)

  # ---- g-branch: depthwise 3x3 = per-tap lane roll + one FMA -----------------
  gdw = tapw_ref[4] * x                              # center tap (kh=kw=1)
  for kh in range(3):
    for kw in range(3):
      k = kh * 3 + kw
      if k == 4:
        continue
      d = (kh - 1) * W + (kw - 1)                    # flat spatial offset
      gdw = gdw + tapw_ref[k] * pltpu.roll(x, shift=(-d) % HW, axis=1)

  # pointwise 1x1 (depthwise bias + bn1 folded in) + ReLU
  g = jnp.maximum(channel_mix(gdw, n_s) + col(3 * n_s + 1), 0.0)

  # ---- attention: C->1 conv (bn_att folded) + sigmoid, per-image broadcast ---
  a = jax.nn.sigmoid(channel_mix(g + xo, 2 * n_s) + col(3 * n_s + 2))

  o_ref[...] = xo * a                                # full-sublane, full-lane store


def attention_block_pallas(x_nchw, params, eps=1e-5):
  N, C, H, W = x_nchw.shape
  NC, HW = N * C, H * W

  # ---- fold BatchNorm (eval mode) + biases into conv weights (host side) -----
  def fold(p):
    gamma, beta, mean, var = p
    s = gamma / jnp.sqrt(var + eps)
    return s, beta - mean * s

  s1, t1 = fold(params["bn1"])
  s2, t2 = fold(params["bn2"])
  bs, bt = fold(params["bn_att"])

  dw_w = params["dw_w"].reshape(C, 9)                # (channel, kh*3+kw)
  pw_w = params["pw_w"].reshape(C, C)                # (out, in)
  c1_w = params["c1_w"].reshape(C, C)                # (out, in)
  aw = params["att_w"].reshape(C)

  pw2 = s1[:, None] * pw_w                           # bn1 scale folded
  b_g = s1 * (pw_w @ params["dw_b"] + params["pw_b"]) + t1   # dw bias folded too
  c12 = s2[:, None] * c1_w                           # bn2 scale folded
  b_x = s2 * params["c1_b"] + t2
  aw2 = bs[0] * aw                                   # bn_att folded
  ab2 = bs[0] * params["att_b"][0] + bt[0]

  # ---- batch-packed block-diagonal channel-mix matrices (NC x NC) ------------
  eye_n = jnp.eye(N, dtype=jnp.float32)
  w_c1 = jnp.kron(eye_n, c12)
  w_pw = jnp.kron(eye_n, pw2)
  w_aw = jnp.kron(eye_n, jnp.tile(aw2[None, :], (C, 1)))   # rank-1 per block

  # Static sublane shifts whose block-diagonal band is non-zero (d=4 drops out
  # for N=2, C=4).
  shifts = tuple(d for d in range(NC)
                 if any(((p + d) % NC) // C == p // C for p in range(NC)))
  p_idx = jnp.arange(NC)

  def shift_cols(w_big):                             # (NC, len(shifts))
    return jnp.stack([w_big[p_idx, (p_idx + d) % NC] for d in shifts], axis=1)

  def per_row(v):                                    # (C,) -> (NC, 1)
    return jnp.tile(v, N)[:, None]

  slab = jnp.concatenate(
      [shift_cols(w_c1), shift_cols(w_pw), shift_cols(w_aw),
       per_row(b_x), per_row(b_g), jnp.full((NC, 1), ab2, jnp.float32)],
      axis=1).astype(jnp.float32)                    # (NC, 3*S + 3)

  # ---- per-tap boundary masks fused with depthwise weights: (9, NC, HW) ------
  hh = np.arange(HW) // W
  ww = np.arange(HW) % W
  masks = np.zeros((9, HW), np.float32)
  for kh in range(3):
    for kw in range(3):
      dh, dw = kh - 1, kw - 1
      masks[kh * 3 + kw] = ((hh + dh >= 0) & (hh + dh < H) &
                            (ww + dw >= 0) & (ww + dw < W))
  tapw = (jnp.asarray(masks)[:, None, :] *
          jnp.tile(dw_w, (N, 1)).T[:, :, None]).astype(jnp.float32)

  # Metadata-only reshape: batch packed onto sublanes, no transpose / pad.
  xf = x_nchw.reshape(NC, HW).astype(jnp.float32)

  kernel = functools.partial(_attention_block_kernel,
                             NC=NC, H=H, W=W, shifts=shifts)
  # Single invocation (no grid): whole problem fits VMEM many times over, so
  # there is no pipeline to run -- 3 input DMAs + 1 output DMA total.
  out = pl.pallas_call(
      kernel,
      out_shape=jax.ShapeDtypeStruct((NC, HW), jnp.float32),
  )(xf, tapw, slab)
  return out.reshape(N, C, H, W)                     # metadata-only reshape


# ---------------------------- pure-JAX reference -----------------------------
def attention_block_ref(x, params, eps=1e-5):
  """Mirrors the PyTorch forward (eval-mode BatchNorm), NCHW throughout."""
  C = x.shape[1]

  def conv(v, w, b, groups=1):
    out = jax.lax.conv_general_dilated(
        v, w, window_strides=(1, 1), padding="SAME",
        dimension_numbers=("NCHW", "OIHW", "NCHW"),
        feature_group_count=groups)
    return out + b[None, :, None, None]

  def bn(v, p):
    gamma, beta, mean, var = p
    return ((v - mean[None, :, None, None])
            / jnp.sqrt(var[None, :, None, None] + eps)
            * gamma[None, :, None, None] + beta[None, :, None, None])

  g = conv(x, params["dw_w"], params["dw_b"], groups=C)
  g = conv(g, params["pw_w"], params["pw_b"])
  xo = conv(x, params["c1_w"], params["c1_b"])
  g = jax.nn.relu(bn(g, params["bn1"]))
  xo = jax.nn.relu(bn(xo, params["bn2"]))
  att = conv(g + xo, params["att_w"], params["att_b"])
  att = jax.nn.sigmoid(bn(att, params["bn_att"]))
  return xo * att


def make_params(C, key):
  ks = jax.random.split(key, 11)

  def bn_p(k, n):
    k1, k2, k3, k4 = jax.random.split(k, 4)
    return (1.0 + 0.1 * jax.random.normal(k1, (n,), jnp.float32),
            0.1 * jax.random.normal(k2, (n,), jnp.float32),
            0.05 * jax.random.normal(k3, (n,), jnp.float32),
            0.9 + 0.1 * jax.random.uniform(k4, (n,), jnp.float32))

  return {
      "dw_w": 0.2 * jax.random.normal(ks[0], (C, 1, 3, 3), jnp.float32),
      "dw_b": 0.1 * jax.random.normal(ks[1], (C,), jnp.float32),
      "pw_w": 0.3 * jax.random.normal(ks[2], (C, C, 1, 1), jnp.float32),
      "pw_b": 0.1 * jax.random.normal(ks[3], (C,), jnp.float32),
      "c1_w": 0.3 * jax.random.normal(ks[4], (C, C, 1, 1), jnp.float32),
      "c1_b": 0.1 * jax.random.normal(ks[5], (C,), jnp.float32),
      "att_w": 0.3 * jax.random.normal(ks[6], (1, C, 1, 1), jnp.float32),
      "att_b": 0.1 * jax.random.normal(ks[7], (1,), jnp.float32),
      "bn1": bn_p(ks[8], C),
      "bn2": bn_p(ks[9], C),
      "bn_att": bn_p(ks[10], 1),
  }


if __name__ == "__main__":
  N, C, H, W = 2, 4, 16, 16
  key = jax.random.PRNGKey(0)
  kx, kp = jax.random.split(key)
  x = jax.random.normal(kx, (N, C, H, W), jnp.float32)
  params = make_params(C, kp)

  out = attention_block_pallas(x, params)
  out = jax.block_until_ready(out)

  ref = attention_block_ref(x, params)
  assert out.shape == (N, C, H, W)
  assert jnp.allclose(out, ref, atol=3e-4, rtol=3e-4), "mismatch vs JAX reference"
  print("KERNEL_OK")
</pallas_src>

<mosaic_0001>
module attributes {stable_mosaic.version = 11 : i64} {
  func.func @_attention_block_kernel(%arg0: memref<8x256xf32, #tpu.memory_space<vmem>>, %arg1: memref<9x8x256xf32, #tpu.memory_space<vmem>>, %arg2: memref<8x24xf32, #tpu.memory_space<vmem>>, %arg3: memref<8x256xf32, #tpu.memory_space<vmem>>) attributes {dimension_semantics = [], scalar_prefetch = 0 : i64, scratch_operands = 0 : i64, tpu.core_type = #tpu.core_type<tc>} {
    %c0 = arith.constant 0 : index
    %c0_0 = arith.constant 0 : index
    %0 = vector.load %arg0[%c0, %c0_0] : memref<8x256xf32, #tpu.memory_space<vmem>>, vector<8x256xf32>
    %c0_1 = arith.constant 0 : index
    %c0_2 = arith.constant 0 : index
    %1 = vector.load %arg2[%c0_1, %c0_2] : memref<8x24xf32, #tpu.memory_space<vmem>>, vector<8x1xf32>
    %2 = vector.broadcast %1 : vector<8x1xf32> to vector<8x256xf32>
    %3 = arith.mulf %2, %0 : vector<8x256xf32>
    %c0_3 = arith.constant 0 : index
    %c1 = arith.constant 1 : index
    %4 = vector.load %arg2[%c0_3, %c1] : memref<8x24xf32, #tpu.memory_space<vmem>>, vector<8x1xf32>
    %c7_i32 = arith.constant 7 : i32
    %5 = tpu.dynamic_rotate %0 by %c7_i32 dim 0 : vector<8x256xf32>, i32 -> vector<8x256xf32>
    %6 = vector.broadcast %4 : vector<8x1xf32> to vector<8x256xf32>
    %7 = arith.mulf %6, %5 : vector<8x256xf32>
    %8 = arith.addf %3, %7 : vector<8x256xf32>
    %c0_4 = arith.constant 0 : index
    %c2 = arith.constant 2 : index
    %9 = vector.load %arg2[%c0_4, %c2] : memref<8x24xf32, #tpu.memory_space<vmem>>, vector<8x1xf32>
    %c6_i32 = arith.constant 6 : i32
    %10 = tpu.dynamic_rotate %0 by %c6_i32 dim 0 : vector<8x256xf32>, i32 -> vector<8x256xf32>
    %11 = vector.broadcast %9 : vector<8x1xf32> to vector<8x256xf32>
    %12 = arith.mulf %11, %10 : vector<8x256xf32>
    %13 = arith.addf %8, %12 : vector<8x256xf32>
    %c0_5 = arith.constant 0 : index
    %c3 = arith.constant 3 : index
    %14 = vector.load %arg2[%c0_5, %c3] : memref<8x24xf32, #tpu.memory_space<vmem>>, vector<8x1xf32>
    %c5_i32 = arith.constant 5 : i32
    %15 = tpu.dynamic_rotate %0 by %c5_i32 dim 0 : vector<8x256xf32>, i32 -> vector<8x256xf32>
    %16 = vector.broadcast %14 : vector<8x1xf32> to vector<8x256xf32>
    %17 = arith.mulf %16, %15 : vector<8x256xf32>
    %18 = arith.addf %13, %17 : vector<8x256xf32>
    %c0_6 = arith.constant 0 : index
    %c4 = arith.constant 4 : index
    %19 = vector.load %arg2[%c0_6, %c4] : memref<8x24xf32, #tpu.memory_space<vmem>>, vector<8x1xf32>
    %c3_i32 = arith.constant 3 : i32
    %20 = tpu.dynamic_rotate %0 by %c3_i32 dim 0 : vector<8x256xf32>, i32 -> vector<8x256xf32>
    %21 = vector.broadcast %19 : vector<8x1xf32> to vector<8x256xf32>
    %22 = arith.mulf %21, %20 : vector<8x256xf32>
    %23 = arith.addf %18, %22 : vector<8x256xf32>
    %c0_7 = arith.constant 0 : index
    %c5 = arith.constant 5 : index
    %24 = vector.load %arg2[%c0_7, %c5] : memref<8x24xf32, #tpu.memory_space<vmem>>, vector<8x1xf32>
    %c2_i32 = arith.constant 2 : i32
    %25 = tpu.dynamic_rotate %0 by %c2_i32 dim 0 : vector<8x256xf32>, i32 -> vector<8x256xf32>
    %26 = vector.broadcast %24 : vector<8x1xf32> to vector<8x256xf32>
    %27 = arith.mulf %26, %25 : vector<8x256xf32>
    %28 = arith.addf %23, %27 : vector<8x256xf32>
    %c0_8 = arith.constant 0 : index
    %c6 = arith.constant 6 : index
    %29 = vector.load %arg2[%c0_8, %c6] : memref<8x24xf32, #tpu.memory_space<vmem>>, vector<8x1xf32>
    %c1_i32 = arith.constant 1 : i32
    %30 = tpu.dynamic_rotate %0 by %c1_i32 dim 0 : vector<8x256xf32>, i32 -> vector<8x256xf32>
    %31 = vector.broadcast %29 : vector<8x1xf32> to vector<8x256xf32>
    %32 = arith.mulf %31, %30 : vector<8x256xf32>
    %33 = arith.addf %28, %32 : vector<8x256xf32>
    %c0_9 = arith.constant 0 : index
    %c21 = arith.constant 21 : index
    %34 = vector.load %arg2[%c0_9, %c21] : memref<8x24xf32, #tpu.memory_space<vmem>>, vector<8x1xf32>
    %35 = vector.broadcast %34 : vector<8x1xf32> to vector<8x256xf32>
    %36 = arith.addf %33, %35 : vector<8x256xf32>
    %cst = arith.constant 0.000000e+00 : f32
    %37 = vector.broadcast %cst : f32 to vector<8x256xf32>
    %38 = arith.maximumf %36, %37 : vector<8x256xf32>
    %c4_10 = arith.constant 4 : index
    %c0_11 = arith.constant 0 : index
    %c0_12 = arith.constant 0 : index
    %39 = vector.load %arg1[%c4_10, %c0_11, %c0_12] : memref<9x8x256xf32, #tpu.memory_space<vmem>>, vector<1x8x256xf32>
    %40 = vector.shape_cast %39 : vector<1x8x256xf32> to vector<8x256xf32>
    %41 = arith.mulf %40, %0 : vector<8x256xf32>
    %c0_13 = arith.constant 0 : index
    %c0_14 = arith.constant 0 : index
    %c0_15 = arith.constant 0 : index
    %42 = vector.load %arg1[%c0_13, %c0_14, %c0_15] : memref<9x8x256xf32, #tpu.memory_space<vmem>>, vector<1x8x256xf32>
    %43 = vector.shape_cast %42 : vector<1x8x256xf32> to vector<8x256xf32>
    %c17_i32 = arith.constant 17 : i32
    %44 = tpu.dynamic_rotate %0 by %c17_i32 dim 1 : vector<8x256xf32>, i32 -> vector<8x256xf32>
    %45 = arith.mulf %43, %44 : vector<8x256xf32>
    %46 = arith.addf %41, %45 : vector<8x256xf32>
    %c1_16 = arith.constant 1 : index
    %c0_17 = arith.constant 0 : index
    %c0_18 = arith.constant 0 : index
    %47 = vector.load %arg1[%c1_16, %c0_17, %c0_18] : memref<9x8x256xf32, #tpu.memory_space<vmem>>, vector<1x8x256xf32>
    %48 = vector.shape_cast %47 : vector<1x8x256xf32> to vector<8x256xf32>
    %c16_i32 = arith.constant 16 : i32
    %49 = tpu.dynamic_rotate %0 by %c16_i32 dim 1 : vector<8x256xf32>, i32 -> vector<8x256xf32>
    %50 = arith.mulf %48, %49 : vector<8x256xf32>
    %51 = arith.addf %46, %50 : vector<8x256xf32>
    %c2_19 = arith.constant 2 : index
    %c0_20 = arith.constant 0 : index
    %c0_21 = arith.constant 0 : index
    %52 = vector.load %arg1[%c2_19, %c0_20, %c0_21] : memref<9x8x256xf32, #tpu.memory_space<vmem>>, vector<1x8x256xf32>
    %53 = vector.shape_cast %52 : vector<1x8x256xf32> to vector<8x256xf32>
    %c15_i32 = arith.constant 15 : i32
    %54 = tpu.dynamic_rotate %0 by %c15_i32 dim 1 : vector<8x256xf32>, i32 -> vector<8x256xf32>
    %55 = arith.mulf %53, %54 : vector<8x256xf32>
    %56 = arith.addf %51, %55 : vector<8x256xf32>
    %c3_22 = arith.constant 3 : index
    %c0_23 = arith.constant 0 : index
    %c0_24 = arith.constant 0 : index
    %57 = vector.load %arg1[%c3_22, %c0_23, %c0_24] : memref<9x8x256xf32, #tpu.memory_space<vmem>>, vector<1x8x256xf32>
    %58 = vector.shape_cast %57 : vector<1x8x256xf32> to vector<8x256xf32>
    %c1_i32_25 = arith.constant 1 : i32
    %59 = tpu.dynamic_rotate %0 by %c1_i32_25 dim 1 : vector<8x256xf32>, i32 -> vector<8x256xf32>
    %60 = arith.mulf %58, %59 : vector<8x256xf32>
    %61 = arith.addf %56, %60 : vector<8x256xf32>
    %c5_26 = arith.constant 5 : index
    %c0_27 = arith.constant 0 : index
    %c0_28 = arith.constant 0 : index
    %62 = vector.load %arg1[%c5_26, %c0_27, %c0_28] : memref<9x8x256xf32, #tpu.memory_space<vmem>>, vector<1x8x256xf32>
    %63 = vector.shape_cast %62 : vector<1x8x256xf32> to vector<8x256xf32>
    %c255_i32 = arith.constant 255 : i32
    %64 = tpu.dynamic_rotate %0 by %c255_i32 dim 1 : vector<8x256xf32>, i32 -> vector<8x256xf32>
    %65 = arith.mulf %63, %64 : vector<8x256xf32>
    %66 = arith.addf %61, %65 : vector<8x256xf32>
    %c6_29 = arith.constant 6 : index
    %c0_30 = arith.constant 0 : index
    %c0_31 = arith.constant 0 : index
    %67 = vector.load %arg1[%c6_29, %c0_30, %c0_31] : memref<9x8x256xf32, #tpu.memory_space<vmem>>, vector<1x8x256xf32>
    %68 = vector.shape_cast %67 : vector<1x8x256xf32> to vector<8x256xf32>
    %c241_i32 = arith.constant 241 : i32
    %69 = tpu.dynamic_rotate %0 by %c241_i32 dim 1 : vector<8x256xf32>, i32 -> vector<8x256xf32>
    %70 = arith.mulf %68, %69 : vector<8x256xf32>
    %71 = arith.addf %66, %70 : vector<8x256xf32>
    %c7 = arith.constant 7 : index
    %c0_32 = arith.constant 0 : index
    %c0_33 = arith.constant 0 : index
    %72 = vector.load %arg1[%c7, %c0_32, %c0_33] : memref<9x8x256xf32, #tpu.memory_space<vmem>>, vector<1x8x256xf32>
    %73 = vector.shape_cast %72 : vector<1x8x256xf32> to vector<8x256xf32>
    %c240_i32 = arith.constant 240 : i32
    %74 = tpu.dynamic_rotate %0 by %c240_i32 dim 1 : vector<8x256xf32>, i32 -> vector<8x256xf32>
    %75 = arith.mulf %73, %74 : vector<8x256xf32>
    %76 = arith.addf %71, %75 : vector<8x256xf32>
    %c8 = arith.constant 8 : index
    %c0_34 = arith.constant 0 : index
    %c0_35 = arith.constant 0 : index
    %77 = vector.load %arg1[%c8, %c0_34, %c0_35] : memref<9x8x256xf32, #tpu.memory_space<vmem>>, vector<1x8x256xf32>
    %78 = vector.shape_cast %77 : vector<1x8x256xf32> to vector<8x256xf32>
    %c239_i32 = arith.constant 239 : i32
    %79 = tpu.dynamic_rotate %0 by %c239_i32 dim 1 : vector<8x256xf32>, i32 -> vector<8x256xf32>
    %80 = arith.mulf %78, %79 : vector<8x256xf32>
    %81 = arith.addf %76, %80 : vector<8x256xf32>
    %c0_36 = arith.constant 0 : index
    %c7_37 = arith.constant 7 : index
    %82 = vector.load %arg2[%c0_36, %c7_37] : memref<8x24xf32, #tpu.memory_space<vmem>>, vector<8x1xf32>
    %83 = vector.broadcast %82 : vector<8x1xf32> to vector<8x256xf32>
    %84 = arith.mulf %83, %81 : vector<8x256xf32>
    %c0_38 = arith.constant 0 : index
    %c8_39 = arith.constant 8 : index
    %85 = vector.load %arg2[%c0_38, %c8_39] : memref<8x24xf32, #tpu.memory_space<vmem>>, vector<8x1xf32>
    %c7_i32_40 = arith.constant 7 : i32
    %86 = tpu.dynamic_rotate %81 by %c7_i32_40 dim 0 : vector<8x256xf32>, i32 -> vector<8x256xf32>
    %87 = vector.broadcast %85 : vector<8x1xf32> to vector<8x256xf32>
    %88 = arith.mulf %87, %86 : vector<8x256xf32>
    %89 = arith.addf %84, %88 : vector<8x256xf32>
    %c0_41 = arith.constant 0 : index
    %c9 = arith.constant 9 : index
    %90 = vector.load %arg2[%c0_41, %c9] : memref<8x24xf32, #tpu.memory_space<vmem>>, vector<8x1xf32>
    %c6_i32_42 = arith.constant 6 : i32
    %91 = tpu.dynamic_rotate %81 by %c6_i32_42 dim 0 : vector<8x256xf32>, i32 -> vector<8x256xf32>
    %92 = vector.broadcast %90 : vector<8x1xf32> to vector<8x256xf32>
    %93 = arith.mulf %92, %91 : vector<8x256xf32>
    %94 = arith.addf %89, %93 : vector<8x256xf32>
    %c0_43 = arith.constant 0 : index
    %c10 = arith.constant 10 : index
    %95 = vector.load %arg2[%c0_43, %c10] : memref<8x24xf32, #tpu.memory_space<vmem>>, vector<8x1xf32>
    %c5_i32_44 = arith.constant 5 : i32
    %96 = tpu.dynamic_rotate %81 by %c5_i32_44 dim 0 : vector<8x256xf32>, i32 -> vector<8x256xf32>
    %97 = vector.broadcast %95 : vector<8x1xf32> to vector<8x256xf32>
    %98 = arith.mulf %97, %96 : vector<8x256xf32>
    %99 = arith.addf %94, %98 : vector<8x256xf32>
    %c0_45 = arith.constant 0 : index
    %c11 = arith.constant 11 : index
    %100 = vector.load %arg2[%c0_45, %c11] : memref<8x24xf32, #tpu.memory_space<vmem>>, vector<8x1xf32>
    %c3_i32_46 = arith.constant 3 : i32
    %101 = tpu.dynamic_rotate %81 by %c3_i32_46 dim 0 : vector<8x256xf32>, i32 -> vector<8x256xf32>
    %102 = vector.broadcast %100 : vector<8x1xf32> to vector<8x256xf32>
    %103 = arith.mulf %102, %101 : vector<8x256xf32>
    %104 = arith.addf %99, %103 : vector<8x256xf32>
    %c0_47 = arith.constant 0 : index
    %c12 = arith.constant 12 : index
    %105 = vector.load %arg2[%c0_47, %c12] : memref<8x24xf32, #tpu.memory_space<vmem>>, vector<8x1xf32>
    %c2_i32_48 = arith.constant 2 : i32
    %106 = tpu.dynamic_rotate %81 by %c2_i32_48 dim 0 : vector<8x256xf32>, i32 -> vector<8x256xf32>
    %107 = vector.broadcast %105 : vector<8x1xf32> to vector<8x256xf32>
    %108 = arith.mulf %107, %106 : vector<8x256xf32>
    %109 = arith.addf %104, %108 : vector<8x256xf32>
    %c0_49 = arith.constant 0 : index
    %c13 = arith.constant 13 : index
    %110 = vector.load %arg2[%c0_49, %c13] : memref<8x24xf32, #tpu.memory_space<vmem>>, vector<8x1xf32>
    %c1_i32_50 = arith.constant 1 : i32
    %111 = tpu.dynamic_rotate %81 by %c1_i32_50 dim 0 : vector<8x256xf32>, i32 -> vector<8x256xf32>
    %112 = vector.broadcast %110 : vector<8x1xf32> to vector<8x256xf32>
    %113 = arith.mulf %112, %111 : vector<8x256xf32>
    %114 = arith.addf %109, %113 : vector<8x256xf32>
    %c0_51 = arith.constant 0 : index
    %c22 = arith.constant 22 : index
    %115 = vector.load %arg2[%c0_51, %c22] : memref<8x24xf32, #tpu.memory_space<vmem>>, vector<8x1xf32>
    %116 = vector.broadcast %115 : vector<8x1xf32> to vector<8x256xf32>
    %117 = arith.addf %114, %116 : vector<8x256xf32>
    %cst_52 = arith.constant 0.000000e+00 : f32
    %118 = vector.broadcast %cst_52 : f32 to vector<8x256xf32>
    %119 = arith.maximumf %117, %118 : vector<8x256xf32>
    %120 = arith.addf %119, %38 : vector<8x256xf32>
    %c0_53 = arith.constant 0 : index
    %c14 = arith.constant 14 : index
    %121 = vector.load %arg2[%c0_53, %c14] : memref<8x24xf32, #tpu.memory_space<vmem>>, vector<8x1xf32>
    %122 = vector.broadcast %121 : vector<8x1xf32> to vector<8x256xf32>
    %123 = arith.mulf %122, %120 : vector<8x256xf32>
    %c0_54 = arith.constant 0 : index
    %c15 = arith.constant 15 : index
    %124 = vector.load %arg2[%c0_54, %c15] : memref<8x24xf32, #tpu.memory_space<vmem>>, vector<8x1xf32>
    %c7_i32_55 = arith.constant 7 : i32
    %125 = tpu.dynamic_rotate %120 by %c7_i32_55 dim 0 : vector<8x256xf32>, i32 -> vector<8x256xf32>
    %126 = vector.broadcast %124 : vector<8x1xf32> to vector<8x256xf32>
    %127 = arith.mulf %126, %125 : vector<8x256xf32>
    %128 = arith.addf %123, %127 : vector<8x256xf32>
    %c0_56 = arith.constant 0 : index
    %c16 = arith.constant 16 : index
    %129 = vector.load %arg2[%c0_56, %c16] : memref<8x24xf32, #tpu.memory_space<vmem>>, vector<8x1xf32>
    %c6_i32_57 = arith.constant 6 : i32
    %130 = tpu.dynamic_rotate %120 by %c6_i32_57 dim 0 : vector<8x256xf32>, i32 -> vector<8x256xf32>
    %131 = vector.broadcast %129 : vector<8x1xf32> to vector<8x256xf32>
    %132 = arith.mulf %131, %130 : vector<8x256xf32>
    %133 = arith.addf %128, %132 : vector<8x256xf32>
    %c0_58 = arith.constant 0 : index
    %c17 = arith.constant 17 : index
    %134 = vector.load %arg2[%c0_58, %c17] : memref<8x24xf32, #tpu.memory_space<vmem>>, vector<8x1xf32>
    %c5_i32_59 = arith.constant 5 : i32
    %135 = tpu.dynamic_rotate %120 by %c5_i32_59 dim 0 : vector<8x256xf32>, i32 -> vector<8x256xf32>
    %136 = vector.broadcast %134 : vector<8x1xf32> to vector<8x256xf32>
    %137 = arith.mulf %136, %135 : vector<8x256xf32>
    %138 = arith.addf %133, %137 : vector<8x256xf32>
    %c0_60 = arith.constant 0 : index
    %c18 = arith.constant 18 : index
    %139 = vector.load %arg2[%c0_60, %c18] : memref<8x24xf32, #tpu.memory_space<vmem>>, vector<8x1xf32>
    %c3_i32_61 = arith.constant 3 : i32
    %140 = tpu.dynamic_rotate %120 by %c3_i32_61 dim 0 : vector<8x256xf32>, i32 -> vector<8x256xf32>
    %141 = vector.broadcast %139 : vector<8x1xf32> to vector<8x256xf32>
    %142 = arith.mulf %141, %140 : vector<8x256xf32>
    %143 = arith.addf %138, %142 : vector<8x256xf32>
    %c0_62 = arith.constant 0 : index
    %c19 = arith.constant 19 : index
    %144 = vector.load %arg2[%c0_62, %c19] : memref<8x24xf32, #tpu.memory_space<vmem>>, vector<8x1xf32>
    %c2_i32_63 = arith.constant 2 : i32
    %145 = tpu.dynamic_rotate %120 by %c2_i32_63 dim 0 : vector<8x256xf32>, i32 -> vector<8x256xf32>
    %146 = vector.broadcast %144 : vector<8x1xf32> to vector<8x256xf32>
    %147 = arith.mulf %146, %145 : vector<8x256xf32>
    %148 = arith.addf %143, %147 : vector<8x256xf32>
    %c0_64 = arith.constant 0 : index
    %c20 = arith.constant 20 : index
    %149 = vector.load %arg2[%c0_64, %c20] : memref<8x24xf32, #tpu.memory_space<vmem>>, vector<8x1xf32>
    %c1_i32_65 = arith.constant 1 : i32
    %150 = tpu.dynamic_rotate %120 by %c1_i32_65 dim 0 : vector<8x256xf32>, i32 -> vector<8x256xf32>
    %151 = vector.broadcast %149 : vector<8x1xf32> to vector<8x256xf32>
    %152 = arith.mulf %151, %150 : vector<8x256xf32>
    %153 = arith.addf %148, %152 : vector<8x256xf32>
    %c0_66 = arith.constant 0 : index
    %c23 = arith.constant 23 : index
    %154 = vector.load %arg2[%c0_66, %c23] : memref<8x24xf32, #tpu.memory_space<vmem>>, vector<8x1xf32>
    %155 = vector.broadcast %154 : vector<8x1xf32> to vector<8x256xf32>
    %156 = arith.addf %153, %155 : vector<8x256xf32>
    %157 = arith.negf %156 : vector<8x256xf32>
    %158 = math.exp %157 : vector<8x256xf32>
    %cst_67 = arith.constant 1.000000e+00 : f32
    %159 = vector.broadcast %cst_67 : f32 to vector<8x256xf32>
    %160 = arith.addf %159, %158 : vector<8x256xf32>
    %161 = arith.divf %159, %160 : vector<8x256xf32>
    %162 = arith.mulf %38, %161 : vector<8x256xf32>
    %c0_68 = arith.constant 0 : index
    %c0_69 = arith.constant 0 : index
    %163 = vector.load %arg3[%c0_68, %c0_69] : memref<8x256xf32, #tpu.memory_space<vmem>>, vector<8x256xf32>
    tpu.vector_store %arg3[%c0_68, %c0_69], %162 {strides = array<i32>} : memref<8x256xf32, #tpu.memory_space<vmem>>, vector<8x256xf32>,
    return
  }
}

</mosaic_0001>

<bundles_post_ra>
// kernel: tpu_custom_call.1
= control target key start
LH: loop header
LB: loop body
LE: loop exit
PB: predicated region body
PF: predicated region fallthrough
CT: control target
= control target key end

     0   :  { %8 = vsyncpa [#allocation3], 0  ;;  %s826_s0 = inlined_call_operand.hbm [shape: f32[8,256], index: 0, kind: input, shape index: {}]   ;;  %s827_s1 = inlined_call_operand.hbm [shape: f32[9,8,256], index: 1, kind: input, shape index: {}]   ;;  %s828_s2 = inlined_call_operand.hbm [shape: f32[8,24], index: 2, kind: input, shape index: {}]   ;;  %s829_s3 = inlined_call_operand.hbm [shape: f32[8,256], index: 3, kind: output, shape index: {}]  }
   0x1   :  { %9 = vsyncpa [#allocation6], 0 }
   0x2   :  { %10 = vsyncpa [#allocation4], 0  ;;  %s594_s12 = smov [#allocation5]   ;;  %s500_s16 = scalar_lea.hbm %s827_s1, 2304 }
   0x3   :  { %s26_s13 = sshll.u32 %s594_s12, 4  ;;  %p501_p0 = scmp.ne.s32.totalorder %s827_s1, %s500_s16  ;;  %s27_s13 = int_to_ptr.vmem [resolvable:$true] %s26_s13 }
   0x4   :  { %p504_p1 = scmp.lt.u32.totalorder %s500_s16, %s827_s1 }
   0x6   :  { %p506_p2 = pnand %p504_p1, %p501_p0 }
   0x8   :  { %509 = shalt.err (!%p506_p2)
}
   0x9   :  { %s510_s21 = scalar_lea.vmem %s27_s13, 2304  ;;  %p515_p4 = scmp.lt.s32.totalorder %s27_s13, %s27_s13 }
   0xa   :  { %p511_p3 = scmp.ne.s32.totalorder %s27_s13, %s510_s21  ;;  %p516_p5 = scmp.lt.s32.totalorder %s510_s21, %s510_s21 }
   0xc   :  { %p517_p6 = por %p516_p5, %p515_p4 }
   0xe   :  { %p518_p7 = pnand %p517_p6, %p511_p3 }
  0x10   :  { %521 = shalt.err (!%p518_p7)
}
  0x11   :  { %s595_s22 = smov 256   ;;  %s596_s23 = smov 16  }
  0x12   :  { %32 = dma.hbm_to_vmem [thread:$0]  %s827_s1, 2304, %s27_s13, [#allocation6], %s595_s22, %s595_s22, %s596_s23  }
  0x13   :  { %s597_s26 = smov [#allocation2]   ;;  %s598_s28 = smov [#allocation7]  }
  0x14   :  { %s17_s27 = sshll.u32 %s597_s26, 4  ;;  %s39_s29 = sshll.u32 %s598_s28, 4  ;;  %s18_s27 = int_to_ptr.vmem [resolvable:$true] %s17_s27  ;;  %s40_s29 = int_to_ptr.vmem [resolvable:$true] %s39_s29 }
  0x15   :  { %s522_s5 = scalar_lea.hbm %s826_s0, 256 }
  0x16   :  { %p523_p8 = scmp.ne.s32.totalorder %s826_s0, %s522_s5  ;;  %p526_p9 = scmp.lt.u32.totalorder %s522_s5, %s826_s0 }
  0x18   :  { %p528_p10 = pnand %p526_p9, %p523_p8 }
  0x1a   :  { %531 = shalt.err (!%p528_p10)
}
  0x1b   :  { %s532_s1 = scalar_lea.vmem %s18_s27, 256  ;;  %p537_p12 = scmp.lt.s32.totalorder %s18_s27, %s18_s27 }
  0x1c   :  { %p533_p11 = scmp.ne.s32.totalorder %s18_s27, %s532_s1  ;;  %p538_p13 = scmp.lt.s32.totalorder %s532_s1, %s532_s1 }
  0x1e   :  { %p539_p0 = por %p538_p13, %p537_p12 }
  0x20   :  { %p540_p1 = pnand %p539_p0, %p533_p11 }
  0x22   :  { %543 = shalt.err (!%p540_p1)
}
  0x23   :  { %20 = dma.hbm_to_vmem [thread:$0]  %s826_s0, 256, %s18_s27, [#allocation3]  }
  0x24   :  { %s544_s14 = scalar_lea.hbm %s828_s2, 128 }
  0x25   :  { %p545_p2 = scmp.ne.s32.totalorder %s828_s2, %s544_s14  ;;  %p548_p3 = scmp.lt.u32.totalorder %s544_s14, %s828_s2 }
  0x27   :  { %p550_p4 = pnand %p548_p3, %p545_p2 }
  0x29   :  { %553 = shalt.err (!%p550_p4)
}
  0x2a   :  { %s554_s19 = scalar_lea.vmem %s40_s29, 128  ;;  %p559_p6 = scmp.lt.s32.totalorder %s40_s29, %s40_s29 }
  0x2b   :  { %p555_p5 = scmp.ne.s32.totalorder %s40_s29, %s554_s19  ;;  %p560_p7 = scmp.lt.s32.totalorder %s554_s19, %s554_s19 }
  0x2d   :  { %p561_p8 = por %p560_p7, %p559_p6 }
  0x2f   :  { %p562_p9 = pnand %p561_p8, %p555_p5 }
  0x31   :  { %565 = shalt.err (!%p562_p9)
}
  0x32   :  { %42 = dma.hbm_to_vmem [thread:$0]  %s828_s2, 128, %s40_s29, [#allocation6]  }
  0x33   :  { %588 = dma.done.wait [#allocation3], 256  }
  0x34   :  { %589 = vsyncadd [#allocation3], 4294967040 }
  0x35   :  { %590 = dma.done.wait [#allocation6], 2432  }
  0x36   :  { %591 = vsyncadd [#allocation6], 4294964864  ;;  %v599_v0 = vmov 1   ;;  %v600_v1 = vmov 0   ;;  %v688_v2 = vld [vmem:[#allocation2] sm:$0xff]  ;;  %s601_s21 = smov 17   ;;  %v141_v36 = vlaneseq }
  0x37   :  { %468 = vset.pattern.permute.xlu1 %v599_v0  ;;  %467 = vset.pattern.permute.xlu0 %v600_v1  ;;  %v693_v3 = vld [vmem:[#allocation2 + $0x8] sm:$0xff]  ;;  %s602_s2 = smov 15   ;;  %s603_s22 = smov 1   ;;  %v708_v4 = vld [vmem:[#allocation7] sm:$0xff]  ;;  %v608_v5 = vmov 7   ;;  %v609_v6 = vmov 8  }
  0x38   :  { %153 = vrot.lane.b32.xlu1 %v688_v2, %s596_s23  ;;  %137 = vrot.lane.b32.xlu0 %v688_v2, %s601_s21  ;;  %s604_s24 = smov 127   ;;  %s605_s25 = smov 113   ;;  %v610_v7 = vmov 2   ;;  %v611_v8 = vmov 3   ;;  %v612_v9 = vmov 9   ;;  %v613_v10 = vmov 11  }
  0x39   :  { %s607_s26 = smov 111   ;;  %v614_v11 = vmov 10   ;;  %v615_v12 = vmov 6   ;;  %v616_v13 = vmov 4   ;;  %v617_v14 = vmov 22   ;;  %v131_v40 = vld [vmem:[#allocation5 + $0x40] sm:$0xff] }
  0x3a   :  { %v618_v15 = vmov 5   ;;  %v619_v16 = vmov 16   ;;  %v620_v17 = vmov 12   ;;  %v621_v18 = vmov 19   ;;  %v132_v43 = vld [vmem:[#allocation5 + $0x48] sm:$0xff]  ;;  %v135_v44 = vld [vmem:[#allocation5] sm:$0xff] }
  0x3b   :  { %v622_v19 = vmov 13   ;;  %v623_v20 = vmov 23   ;;  %v624_v21 = vmov 21   ;;  %v625_v22 = vmov 14   ;;  %v136_v45 = vld [vmem:[#allocation5 + $0x8] sm:$0xff]  ;;  %v151_v54 = vld [vmem:[#allocation5 + $0x10] sm:$0xff] }
  0x3c   :  { %155 = vrot.lane.b32.xlu1 %v693_v3, %s596_s23  ;;  %139 = vrot.lane.b32.xlu0 %v693_v3, %s601_s21  ;;  %s606_s23 = smov 112   ;;  %v626_v23 = vmov 15   ;;  %v627_v24 = vmov 17   ;;  %v628_v25 = vmov 18   ;;  %v629_v26 = vmov 20   ;;  %v152_v55 = vld [vmem:[#allocation5 + $0x18] sm:$0xff] }
  0x3d   :  { %v736_v37 = vand.u32 127, %v141_v36  ;;  %v134_v48 = vmul.f32 %v132_v43, %v693_v3  ;;  %v133_v49 = vmul.f32 %v131_v40, %v688_v2  ;;  %v165_v61 = vld [vmem:[#allocation5 + $0x20] sm:$0xff]  ;;  %v166_v62 = vld [vmem:[#allocation5 + $0x28] sm:$0xff]  ;;  %s630_s27 = smov [#allocation8]  }
  0x3e   :  { %v235_v43 = vld [vmem:[#allocation5 + $0x80] sm:$0xff]  ;;  %s418_s28 = sshll.u32 %s630_s27, 4  ;;  %s419_s28 = int_to_ptr.vmem [resolvable:$true] %s418_s28 }
  0x3f   :  { %vm143_vm0 = vcmp.lt.s32.totalorder %v736_v37, 17  ;;  %vm157_vm1 = vcmp.lt.s32.totalorder %v736_v37, 16  ;;  %vm171_vm2 = vcmp.lt.s32.totalorder %v736_v37, 15  ;;  %vm185_vm3 = vcmp.lt.s32.totalorder %v736_v37, 1  ;;  %s566_s29 = scalar_lea.vmem %s419_s28, 256  ;;  %p571_p11 = scmp.lt.s32.totalorder %s419_s28, %s419_s28 }
  0x40   :  { %169 = vrot.lane.b32.xlu1 %v693_v3, %s602_s2  ;;  %167 = vrot.lane.b32.xlu0 %v688_v2, %s602_s2  ;;  %vm199_vm4 = vcmp.lt.s32.totalorder %v736_v37, 127  ;;  %vm213_vm5 = vcmp.lt.s32.totalorder %v736_v37, 113  ;;  %vm227_vm6 = vcmp.lt.s32.totalorder %v736_v37, 112  ;;  %vm241_vm7 = vcmp.lt.s32.totalorder %v736_v37, 111  ;;  %p567_p10 = scmp.ne.s32.totalorder %s419_s28, %s566_s29  ;;  %p572_p12 = scmp.lt.s32.totalorder %s566_s29, %s566_s29 }
  0x41   :  { %v63_v37 = vrot.slane %v693_v3, 1 }
  0x42   :  { %p573_p13 = por %p572_p12, %p571_p11 }
  0x44   :  { %183 = vrot.lane.b32.xlu1 %v693_v3, %s603_s22  ;;  %181 = vrot.lane.b32.xlu0 %v688_v2, %s603_s22  ;;  %p574_p0 = pnand %p573_p13, %p567_p10 }
  0x48   :  { %197 = vrot.lane.b32.xlu1 %v693_v3, %s604_s24  ;;  %195 = vrot.lane.b32.xlu0 %v688_v2, %s604_s24 }
  0x4c   :  { %211 = vrot.lane.b32.xlu1 %v693_v3, %s605_s25  ;;  %209 = vrot.lane.b32.xlu0 %v688_v2, %s605_s25 }
  0x50   :  { %225 = vrot.lane.b32.xlu1 %v693_v3, %s606_s23  ;;  %223 = vrot.lane.b32.xlu0 %v688_v2, %s606_s23 }
  0x54   :  { %65 = vperm.xlu1 %468, %v708_v4   ;;  %57 = vperm.xlu0 %467, %v708_v4  }
  0x58   :  { %237 = vrot.lane.b32.xlu1 %v688_v2, %s607_s26  ;;  %239 = vrot.lane.b32.xlu0 %v693_v3, %s607_s26 }
  0x59   :  { %469 = vset.pattern.permute.xlu1 %v608_v5  ;;  %470 = vset.pattern.permute.xlu0 %v609_v6  ;;  %v179_v6 = vld [vmem:[#allocation5 + $0x30] sm:$0xff] }
  0x5c   :  { %249 = vperm.xlu1 %469, %v708_v4   ;;  %257 = vperm.xlu0 %470, %v708_v4  }
  0x60   :  { %471 = vset.pattern.permute.xlu1 %v610_v7  ;;  %473 = vset.pattern.permute.xlu0 %v611_v8  ;;  %v180_v7 = vld [vmem:[#allocation5 + $0x38] sm:$0xff] }
  0x61   :  { %75 = vperm.xlu1 %471, %v708_v4   ;;  %85 = vperm.xlu0 %473, %v708_v4  }
  0x65   :  { %472 = vset.pattern.permute.xlu1 %v612_v9  ;;  %476 = vset.pattern.permute.xlu0 %v613_v10 }
  0x66   :  { %267 = vperm.xlu1 %472, %v708_v4   ;;  %287 = vperm.xlu0 %476, %v708_v4  }
  0x6a   :  { %474 = vset.pattern.permute.xlu1 %v614_v11  ;;  %479 = vset.pattern.permute.xlu0 %v615_v12 }
  0x6b   :  { %277 = vperm.xlu1 %474, %v708_v4   ;;  %115 = vperm.xlu0 %479, %v708_v4  }
  0x6f   :  { %475 = vset.pattern.permute.xlu1 %v616_v13  ;;  %482 = vset.pattern.permute.xlu0 %v617_v14 }
  0x70   :  { %95 = vperm.xlu1 %475, %v708_v4   ;;  %315 = vperm.xlu0 %482, %v708_v4  }
  0x74   :  { %477 = vset.pattern.permute.xlu1 %v618_v15  ;;  %485 = vset.pattern.permute.xlu0 %v619_v16  ;;  %v193_v15 = vld [vmem:[#allocation5 + $0x50] sm:$0xff]  ;;  %v194_v16 = vld [vmem:[#allocation5 + $0x58] sm:$0xff] }
  0x75   :  { %105 = vperm.xlu1 %477, %v708_v4   ;;  %343 = vperm.xlu0 %485, %v708_v4  }
  0x79   :  { %478 = vset.pattern.permute.xlu1 %v620_v17  ;;  %488 = vset.pattern.permute.xlu0 %v621_v18 }
  0x7a   :  { %297 = vperm.xlu1 %478, %v708_v4   ;;  %373 = vperm.xlu0 %488, %v708_v4  }
  0x7e   :  { %480 = vset.pattern.permute.xlu1 %v622_v19  ;;  %491 = vset.pattern.permute.xlu0 %v623_v20 }
  0x7f   :  { %307 = vperm.xlu1 %480, %v708_v4  }
  0x83   :  { %481 = vset.pattern.permute.xlu1 %v624_v21  ;;  %v207_v21 = vld [vmem:[#allocation5 + $0x60] sm:$0xff] }
  0x84   :  { %123 = vperm.xlu1 %481, %v708_v4  }
  0x88   :  { %483 = vset.pattern.permute.xlu1 %v625_v22  ;;  %v208_v22 = vld [vmem:[#allocation5 + $0x68] sm:$0xff] }
  0x89   :  { %325 = vperm.xlu1 %483, %v708_v4  }
  0x8d   :  { %484 = vset.pattern.permute.xlu1 %v626_v23 }
  0x8e   :  { %333 = vperm.xlu1 %484, %v708_v4  }
  0x92   :  { %486 = vset.pattern.permute.xlu1 %v627_v24 }
  0x93   :  { %353 = vperm.xlu1 %486, %v708_v4  }
  0x97   :  { %487 = vset.pattern.permute.xlu1 %v628_v25 }
  0x98   :  { %363 = vperm.xlu1 %487, %v708_v4  }
  0x9c   :  { %489 = vset.pattern.permute.xlu1 %v629_v26 }
  0x9d   :  { %383 = vperm.xlu1 %489, %v708_v4  }
  0xa1   :  { %490 = vset.pattern.permute.xlu1 %v623_v20 }
  0xa2   :  { %391 = vperm.xlu1 %490, %v708_v4  }
  0xaa   :  { %v154_v27 = vpop.permute.xlu1 %153  ;;  %v138_v28 = vpop.permute.xlu0 %137 }
  0xae   :  { %v156_v29 = vpop.permute.xlu1 %155  ;;  %v140_v30 = vpop.permute.xlu0 %139 }
  0xaf   :  { %v144_v46 = vsel %vm143_vm0, %v138_v28, %v140_v30  ;;  %v145_v47 = vsel %vm143_vm0, %v140_v30, %v138_v28  ;;  %v158_v56 = vsel %vm157_vm1, %v154_v27, %v156_v29  ;;  %v159_v57 = vsel %vm157_vm1, %v156_v29, %v154_v27  ;;  %v221_v30 = vld [vmem:[#allocation5 + $0x70] sm:$0xff] }
  0xb0   :  { %v146_v50 = vmul.f32 %v145_v47, %v135_v44  ;;  %v147_v51 = vmul.f32 %v144_v46, %v136_v45  ;;  %v160_v1 = vmul.f32 %v159_v57, %v151_v54  ;;  %v161_v4 = vmul.f32 %v158_v56, %v152_v55  ;;  %v236_v44 = vld [vmem:[#allocation5 + $0x88] sm:$0xff] }
  0xb2   :  { %v170_v31 = vpop.permute.xlu1 %169  ;;  %v168_v32 = vpop.permute.xlu0 %167  ;;  %v148_v58 = vadd.f32 %v146_v50, %v133_v49  ;;  %v149_v59 = vadd.f32 %v147_v51, %v134_v48 }
  0xb3   :  { %v172_v63 = vsel %vm171_vm2, %v168_v32, %v170_v31  ;;  %v173_v0 = vsel %vm171_vm2, %v170_v31, %v168_v32  ;;  %v222_v31 = vld [vmem:[#allocation5 + $0x78] sm:$0xff] }
  0xb4   :  { %v163_v10 = vadd.f32 %v161_v4, %v149_v59  ;;  %v162_v11 = vadd.f32 %v160_v1, %v148_v58  ;;  %v174_v12 = vmul.f32 %v173_v0, %v165_v61  ;;  %v175_v13 = vmul.f32 %v172_v63, %v166_v62 }
  0xb5   :  { %v73_v63 = vrot.slane %v693_v3, 2  ;;  %v72_v0 = vrot.slane %v688_v2, 2  ;;  %v83_v1 = vrot.slane %v693_v3, 3  ;;  %v82_v4 = vrot.slane %v688_v2, 3 }
  0xb6   :  { %v184_v33 = vpop.permute.xlu1 %183  ;;  %v182_v34 = vpop.permute.xlu0 %181  ;;  %v176_v25 = vadd.f32 %v174_v12, %v162_v11  ;;  %v177_v26 = vadd.f32 %v175_v13, %v163_v10 }
  0xb7   :  { %v186_v8 = vsel %vm185_vm3, %v182_v34, %v184_v33  ;;  %v187_v9 = vsel %vm185_vm3, %v184_v33, %v182_v34 }
  0xb8   :  { %v188_v19 = vmul.f32 %v187_v9, %v179_v6  ;;  %v189_v20 = vmul.f32 %v186_v8, %v180_v7  ;;  %v93_v6 = vrot.slane %v693_v3, 5  ;;  %v92_v8 = vrot.slane %v688_v2, 5 }
  0xba   :  { %v198_v35 = vpop.permute.xlu1 %197  ;;  %v196_v38 = vpop.permute.xlu0 %195  ;;  %v191_v36 = vadd.f32 %v189_v20, %v177_v26 }
  0xbb   :  { %v200_v17 = vsel %vm199_vm4, %v196_v38, %v198_v35  ;;  %v201_v18 = vsel %vm199_vm4, %v198_v35, %v196_v38  ;;  %v190_v35 = vadd.f32 %v188_v19, %v176_v25 }
  0xbc   :  { %v202_v27 = vmul.f32 %v200_v17, %v193_v15  ;;  %v203_v28 = vmul.f32 %v201_v18, %v194_v16 }
  0xbe   :  { %v212_v39 = vpop.permute.xlu1 %211  ;;  %v210_v41 = vpop.permute.xlu0 %209  ;;  %v204_v45 = vadd.f32 %v202_v27, %v190_v35  ;;  %v205_v46 = vadd.f32 %v203_v28, %v191_v36  ;;  %v103_v27 = vrot.slane %v693_v3, 6 }
  0xbf   :  { %v214_v23 = vsel %vm213_vm5, %v210_v41, %v212_v39  ;;  %v215_v24 = vsel %vm213_vm5, %v212_v39, %v210_v41 }
  0xc0   :  { %v216_v38 = vmul.f32 %v214_v23, %v207_v21  ;;  %v217_v40 = vmul.f32 %v215_v24, %v208_v22 }
  0xc2   :  { %v226_v42 = vpop.permute.xlu1 %225  ;;  %v224_v53 = vpop.permute.xlu0 %223  ;;  %v218_v49 = vadd.f32 %v216_v38, %v204_v45  ;;  %v219_v50 = vadd.f32 %v217_v40, %v205_v46 }
  0xc3   :  { %v228_v32 = vsel %vm227_vm6, %v224_v53, %v226_v42  ;;  %v229_v33 = vsel %vm227_vm6, %v226_v42, %v224_v53 }
  0xc4   :  { %v230_v47 = vmul.f32 %v228_v32, %v221_v30  ;;  %v231_v48 = vmul.f32 %v229_v33, %v222_v31 }
  0xc6   :  { %v232_v54 = vadd.f32 %v230_v47, %v218_v49  ;;  %v233_v55 = vadd.f32 %v231_v48, %v219_v50 }
  0xd3   :  { %v742_v52 = vpop.permute.xlu1 %65  ;;  %v747_v5 = vpop.permute.xlu0 %57 }
  0xd4   :  { %v69_v10 = vmul.f32 %v742_v52, %v63_v37  ;;  %v60_v11 = vmul.f32 %v747_v5, %v688_v2  ;;  %v61_v12 = vmul.f32 %v747_v5, %v693_v3 }
  0xd6   :  { %v71_v26 = vadd.f32 %v69_v10, %v61_v12 }
  0xd7   :  { %v238_v60 = vpop.permute.xlu1 %237  ;;  %v240_v29 = vpop.permute.xlu0 %239 }
  0xd8   :  { %v242_v39 = vsel %vm241_vm7, %v238_v60, %v240_v29  ;;  %v243_v41 = vsel %vm241_vm7, %v240_v29, %v238_v60  ;;  %v62_v60 = vrot.slane %v688_v2, 1  ;;  %v102_v29 = vrot.slane %v688_v2, 6 }
  0xd9   :  { %v244_v42 = vmul.f32 %v242_v39, %v235_v43  ;;  %v245_v51 = vmul.f32 %v243_v41, %v236_v44  ;;  %v113_v44 = vrot.slane %v693_v3, 7  ;;  %v112_v39 = vrot.slane %v688_v2, 7 }
  0xda   :  { %v68_v9 = vmul.f32 %v742_v52, %v62_v60 }
  0xdb   :  { %v750_v14 = vpop.permute.xlu1 %249  ;;  %v762_v56 = vadd.f32 %v244_v42, %v232_v54  ;;  %v764_v57 = vadd.f32 %v245_v51, %v233_v55  ;;  %v258_v59 = vpop.permute.xlu0 %257 }
  0xdc   :  { %v70_v25 = vadd.f32 %v68_v9, %v60_v11 }
  0xdd   :  { %v255_v61 = vrot.slane %v764_v57, 1  ;;  %v254_v62 = vrot.slane %v762_v56, 1  ;;  %v264_v17 = vrot.slane %v762_v56, 2  ;;  %v265_v18 = vrot.slane %v764_v57, 2 }
  0xde   :  { %v252_v19 = vmul.f32 %v750_v14, %v762_v56  ;;  %v253_v20 = vmul.f32 %v750_v14, %v764_v57  ;;  %v274_v24 = vrot.slane %v762_v56, 3  ;;  %v275_v5 = vrot.slane %v764_v57, 3 }
  0xdf   :  { %v260_v13 = vmul.f32 %v258_v59, %v254_v62  ;;  %v261_v15 = vmul.f32 %v258_v59, %v255_v61  ;;  %v285_v41 = vrot.slane %v764_v57, 5  ;;  %v284_v45 = vrot.slane %v762_v56, 5 }
  0xe0   :  { %v76_v34 = vpop.permute.xlu1 %75  ;;  %v86_v16 = vpop.permute.xlu0 %85  ;;  %v294_v42 = vrot.slane %v762_v56, 6  ;;  %v295_v51 = vrot.slane %v764_v57, 6 }
  0xe1   :  { %v78_v52 = vmul.f32 %v76_v34, %v72_v0  ;;  %v79_v21 = vmul.f32 %v76_v34, %v73_v63  ;;  %v262_v30 = vadd.f32 %v260_v13, %v252_v19  ;;  %v263_v31 = vadd.f32 %v261_v15, %v253_v20 }
  0xe2   :  { %v88_v34 = vmul.f32 %v86_v16, %v82_v4  ;;  %v89_v36 = vmul.f32 %v86_v16, %v83_v1  ;;  %v304_v1 = vrot.slane %v762_v56, 7  ;;  %v305_v4 = vrot.slane %v764_v57, 7 }
  0xe3   :  { %v80_v14 = vadd.f32 %v78_v52, %v70_v25  ;;  %v81_v35 = vadd.f32 %v79_v21, %v71_v26 }
  0xe5   :  { %v268_v53 = vpop.permute.xlu1 %267  ;;  %v288_v43 = vpop.permute.xlu0 %287  ;;  %v91_v54 = vadd.f32 %v89_v36, %v81_v35 }
  0xe6   :  { %v270_v22 = vmul.f32 %v268_v53, %v264_v17  ;;  %v271_v23 = vmul.f32 %v268_v53, %v265_v18  ;;  %v90_v53 = vadd.f32 %v88_v34, %v80_v14  ;;  %v290_v3 = vmul.f32 %v288_v43, %v284_v45 }
  0xe7   :  { %v291_v59 = vmul.f32 %v288_v43, %v285_v41 }
  0xe8   :  { %v272_v38 = vadd.f32 %v270_v22, %v262_v30  ;;  %v273_v40 = vadd.f32 %v271_v23, %v263_v31 }
  0xea   :  { %v278_v58 = vpop.permute.xlu1 %277  ;;  %v116_v2 = vpop.permute.xlu0 %115 }
  0xeb   :  { %v280_v32 = vmul.f32 %v278_v58, %v274_v24  ;;  %v281_v33 = vmul.f32 %v278_v58, %v275_v5  ;;  %v119_v9 = vmul.f32 %v116_v2, %v113_v44 }
  0xed   :  { %v282_v48 = vadd.f32 %v280_v32, %v272_v38  ;;  %v283_v49 = vadd.f32 %v281_v33, %v273_v40 }
  0xef   :  { %v96_v7 = vpop.permute.xlu1 %95  ;;  %v292_v63 = vadd.f32 %v290_v3, %v282_v48  ;;  %v293_v0 = vadd.f32 %v291_v59, %v283_v49  ;;  %v316_v16 = vpop.permute.xlu0 %315 }
  0xf0   :  { %v98_v46 = vmul.f32 %v96_v7, %v92_v8  ;;  %v99_v47 = vmul.f32 %v96_v7, %v93_v6  ;;  %v118_v8 = vmul.f32 %v116_v2, %v112_v39 }
  0xf2   :  { %v100_v61 = vadd.f32 %v98_v46, %v90_v53  ;;  %v101_v62 = vadd.f32 %v99_v47, %v91_v54 }
  0xf4   :  { %v106_v28 = vpop.permute.xlu1 %105  ;;  %v344_v43 = vpop.permute.xlu0 %343 }
  0xf5   :  { %v108_v55 = vmul.f32 %v106_v28, %v102_v29  ;;  %v109_v58 = vmul.f32 %v106_v28, %v103_v27 }
  0xf7   :  { %v110_v6 = vadd.f32 %v108_v55, %v100_v61  ;;  %v111_v7 = vadd.f32 %v109_v58, %v101_v62 }
  0xf9   :  { %v298_v50 = vpop.permute.xlu1 %297  ;;  %v120_v19 = vadd.f32 %v118_v8, %v110_v6  ;;  %v121_v20 = vadd.f32 %v119_v9, %v111_v7  ;;  %v374_v55 = vpop.permute.xlu0 %373 }
  0xfa   :  { %v300_v37 = vmul.f32 %v298_v50, %v294_v42  ;;  %v301_v60 = vmul.f32 %v298_v50, %v295_v51 }
  0xfc   :  { %v302_v11 = vadd.f32 %v300_v37, %v292_v63  ;;  %v303_v12 = vadd.f32 %v301_v60, %v293_v0 }
  0xfe   :  { %v308_v10 = vpop.permute.xlu1 %307 }
  0xff   :  { %v310_v13 = vmul.f32 %v308_v10, %v304_v1  ;;  %v311_v15 = vmul.f32 %v308_v10, %v305_v4 }
 0x101   :  { %v313_v17 = vadd.f32 %v311_v15, %v303_v12  ;;  %v312_v18 = vadd.f32 %v310_v13, %v302_v11 }
 0x103   :  { %v318_v52 = vadd.f32 %v316_v16, %v312_v18  ;;  %v319_v21 = vadd.f32 %v316_v16, %v313_v17  ;;  %v124_v22 = vpop.permute.xlu1 %123 }
 0x104   :  { %v800_v56 = vadd.f32 %v124_v22, %v120_v19  ;;  %v802_v57 = vadd.f32 %v124_v22, %v121_v20 }
 0x105   :  { %v320_v23 = vmax.f32 %v318_v52, 0.0  ;;  %v321_v24 = vmax.f32 %v319_v21, 0.0 }
 0x106   :  { %v128_v5 = vmax.f32 %v800_v56, 0.0  ;;  %v129_v25 = vmax.f32 %v802_v57, 0.0 }
 0x108   :  { %v322_v26 = vadd.f32 %v320_v23, %v128_v5  ;;  %v323_v27 = vadd.f32 %v321_v24, %v129_v25  ;;  %v326_v28 = vpop.permute.xlu1 %325 }
 0x10a   :  { %v330_v29 = vrot.slane %v322_v26, 1  ;;  %v331_v30 = vrot.slane %v323_v27, 1  ;;  %v341_v31 = vrot.slane %v323_v27, 2  ;;  %v340_v32 = vrot.slane %v322_v26, 2 }
 0x10b   :  { %v328_v14 = vmul.f32 %v326_v28, %v322_v26  ;;  %v329_v35 = vmul.f32 %v326_v28, %v323_v27  ;;  %v350_v45 = vrot.slane %v322_v26, 3  ;;  %v351_v46 = vrot.slane %v323_v27, 3 }
 0x10c   :  { %v346_v44 = vmul.f32 %v344_v43, %v340_v32  ;;  %v347_v39 = vmul.f32 %v344_v43, %v341_v31  ;;  %v371_v42 = vrot.slane %v323_v27, 6  ;;  %v370_v51 = vrot.slane %v322_v26, 6 }
 0x10d   :  { %v334_v33 = vpop.permute.xlu1 %333  ;;  %v360_v53 = vrot.slane %v322_v26, 5  ;;  %v361_v54 = vrot.slane %v323_v27, 5  ;;  %v380_v0 = vrot.slane %v322_v26, 7  ;;  %v381_v1 = vrot.slane %v323_v27, 7 }
 0x10e   :  { %v336_v34 = vmul.f32 %v334_v33, %v330_v29  ;;  %v337_v36 = vmul.f32 %v334_v33, %v331_v30  ;;  %v376_v60 = vmul.f32 %v374_v55, %v370_v51  ;;  %v377_v61 = vmul.f32 %v374_v55, %v371_v42 }
 0x110   :  { %v338_v38 = vadd.f32 %v336_v34, %v328_v14  ;;  %v339_v40 = vadd.f32 %v337_v36, %v329_v35 }
 0x112   :  { %v354_v41 = vpop.permute.xlu1 %353  ;;  %v348_v47 = vadd.f32 %v346_v44, %v338_v38  ;;  %v349_v48 = vadd.f32 %v347_v39, %v339_v40 }
 0x113   :  { %v356_v49 = vmul.f32 %v354_v41, %v350_v45  ;;  %v357_v50 = vmul.f32 %v354_v41, %v351_v46 }
 0x115   :  { %v358_v3 = vadd.f32 %v356_v49, %v348_v47  ;;  %v359_v59 = vadd.f32 %v357_v50, %v349_v48 }
 0x117   :  { %v364_v58 = vpop.permute.xlu1 %363 }
 0x118   :  { %v366_v2 = vmul.f32 %v364_v58, %v360_v53  ;;  %v367_v37 = vmul.f32 %v364_v58, %v361_v54 }
 0x11a   :  { %v368_v62 = vadd.f32 %v366_v2, %v358_v3  ;;  %v369_v63 = vadd.f32 %v367_v37, %v359_v59 }
 0x11c   :  { %v384_v4 = vpop.permute.xlu1 %383  ;;  %v378_v6 = vadd.f32 %v376_v60, %v368_v62  ;;  %v379_v7 = vadd.f32 %v377_v61, %v369_v63 }
 0x11d   :  { %v386_v8 = vmul.f32 %v384_v4, %v380_v0  ;;  %v387_v9 = vmul.f32 %v384_v4, %v381_v1 }
 0x11f   :  { %v388_v10 = vadd.f32 %v386_v8, %v378_v6  ;;  %v389_v11 = vadd.f32 %v387_v9, %v379_v7 }
 0x121   :  { %v392_v12 = vpop.permute.xlu1 %391 }
 0x122   :  { %v394_v13 = vadd.f32 %v392_v12, %v388_v10  ;;  %v395_v15 = vadd.f32 %v392_v12, %v389_v11 }
 0x124   :  { %v428_v16 = vmul.f32 -1.442695, %v394_v13  ;;  %v429_v17 = vmul.f32 -1.442695, %v395_v15 }
 0x126   :  { %492 = vpow2.f32 %v428_v16 }
 0x127   :  { %494 = vpow2.f32 %v429_v17 }
 0x130   :  { %v493_v18 = vpop.eup %492 }
 0x131   :  { %v495_v19 = vpop.eup %494  ;;  %v402_v20 = vadd.f32 1.0, %v493_v18 }
 0x132   :  { %v403_v52 = vadd.f32 1.0, %v495_v19 }
 0x133   :  { %496 = vrcp.f32 %v402_v20 }
 0x134   :  { %498 = vrcp.f32 %v403_v52 }
 0x13d   :  { %v497_v21 = vpop.eup %496 }
 0x13e   :  { %v499_v22 = vpop.eup %498  ;;  %v408_v23 = vmul.f32 %v497_v21, %v128_v5 }
 0x13f   :  { %v409_v24 = vmul.f32 %v499_v22, %v129_v25 }
 0x140   :  { %410 = vst [vmem:[#allocation8] sm:$0xff] %v408_v23 }
 0x141   :  { %411 = vst [vmem:[#allocation8 + $0x8] sm:$0xff] %v409_v24 }
 0x142   :  { %577 = shalt.err (!%p574_p0)
}
 0x143   :  { %s578_s5 = scalar_lea.hbm %s829_s3, 256 }
 0x144   :  { %p579_p1 = scmp.ne.s32.totalorder %s829_s3, %s578_s5  ;;  %p582_p2 = scmp.lt.u32.totalorder %s578_s5, %s829_s3 }
 0x146   :  { %p584_p3 = pnand %p582_p2, %p579_p1 }
 0x148   :  { %587 = shalt.err (!%p584_p3)
}
 0x149   :  { %421 = dma.vmem_to_hbm [thread:$0]  %s419_s28, 256, %s829_s3, [#allocation4]  }
 0x14a   :  { %592 = dma.done.wait [#allocation4], 256  }
 0x14b   :  { %593 = vsyncadd [#allocation4], 4294967040 }
 0x14c   :  { %425 = vsyncpa [#allocation3], 1 }
 0x14d   :  { %426 = vsyncpa [#allocation6], 1 }
 0x14e   :  { %427 = vsyncpa [#allocation4], 1 }

</bundles_post_ra>
